<compile_context>
chip_gen: v7x
topology: tpu7x:2x2x1
jax: 0.10.0
libtpu: 0.0.40
codegen_flags: <defaults>
</compile_context>

<pallas_src>
import functools

import numpy as np
import jax
import jax.numpy as jnp
from jax.experimental import pallas as pl
from jax.experimental.pallas import tpu as pltpu


_NEG = float(-1.0e30)   # softmax-neutral pad logit (exp underflows to 0 even after /beta)


def _round_up(x, m):
    return ((int(x) + m - 1) // m) * m


def _top_k_inds(vals, k):
    """Indices of the k largest entries (unordered set; argpartition, no full sort)."""
    k = int(k)
    if k >= vals.shape[0]:
        return np.arange(vals.shape[0], dtype=np.int64)
    return np.argpartition(vals, -k)[-k:]


# ----------------------------- Pallas kernels ------------------------------ #

def _matmul_kernel(a_ref, b_ref, o_ref, acc_ref):
    """(tm, tk) bf16 @ (tk, tn) bf16 -> f32, accumulated over the k grid axis."""
    @pl.when(pl.program_id(2) == 0)
    def _init():
        acc_ref[...] = jnp.zeros_like(acc_ref)

    acc_ref[...] += jnp.dot(a_ref[...], b_ref[...],
                            preferred_element_type=jnp.float32)

    @pl.when(pl.program_id(2) == pl.num_programs(2) - 1)
    def _store():
        o_ref[...] = acc_ref[...].astype(o_ref.dtype)


def matmul_nt(a, b_t, *, tm=256, tn=256, tk=512):
    """a: (N, D), b_t: (D, P) -> (N, P) f32 = a @ b_t.

    Operands are fed to the MXU in bf16 (native rate, half the DMA bytes); the
    accumulator stays f32 in VMEM.
    """
    a = jnp.asarray(a).astype(jnp.bfloat16)
    b_t = jnp.asarray(b_t).astype(jnp.bfloat16)
    n, d = a.shape
    d2, m = b_t.shape
    assert d == d2
    tm = min(tm, _round_up(n, 16))          # bf16 sublane packing -> multiples of 16
    tn = min(tn, _round_up(m, 128))
    tk = min(tk, _round_up(d, 128))
    n_p, m_p, d_p = _round_up(n, tm), _round_up(m, tn), _round_up(d, tk)
    a_p = jnp.pad(a, ((0, n_p - n), (0, d_p - d)))
    b_p = jnp.pad(b_t, ((0, d_p - d), (0, m_p - m)))

    cost = pl.CostEstimate(
        flops=2 * n_p * m_p * d_p,
        transcendentals=0,
        bytes_accessed=2 * (n_p * d_p + d_p * m_p) + 4 * n_p * m_p,
    )
    out = pl.pallas_call(
        _matmul_kernel,
        out_shape=jax.ShapeDtypeStruct((n_p, m_p), jnp.float32),
        grid=(n_p // tm, m_p // tn, d_p // tk),
        in_specs=[pl.BlockSpec((tm, tk), lambda i, j, k: (i, k)),
                  pl.BlockSpec((tk, tn), lambda i, j, k: (k, j))],
        out_specs=pl.BlockSpec((tm, tn), lambda i, j, k: (i, j)),
        scratch_shapes=[pltpu.VMEM((tm, tn), jnp.float32)],
        compiler_params=pltpu.CompilerParams(
            dimension_semantics=("parallel", "parallel", "arbitrary")),
        cost_estimate=cost,
    )(a_p, b_p)
    return out[:n, :m]


def _wls_sum_kernel(x_ref, w_ref, o_ref, acc_ref, *, inv_beta):
    """Accumulate -sum_ij w[i,j] * log_softmax(inv_beta * x[i])[j] into one scalar."""
    @pl.when(pl.program_id(0) == 0)
    def _init():
        acc_ref[...] = jnp.zeros_like(acc_ref)

    x = x_ref[...] * inv_beta                                    # f32 math (v5e-safe)
    w = w_ref[...]
    mx = jnp.max(x, axis=-1, keepdims=True)
    lse = jnp.log(jnp.sum(jnp.exp(x - mx), axis=-1, keepdims=True)) + mx
    per_row = jnp.sum(w * (x - lse), axis=-1, keepdims=True)     # (tr, 1)
    acc_ref[...] -= jnp.sum(per_row, axis=0, keepdims=True)      # (1, 1) accumulate

    @pl.when(pl.program_id(0) == pl.num_programs(0) - 1)
    def _store():
        o_ref[...] = acc_ref[...]


def weighted_logsoftmax_sum(x, w, *, inv_beta, tr=128):
    """x, w: (R, L) -> scalar = -sum_ij w[i,j] * log_softmax(inv_beta * x[i])[j].

    One launch for every loss row in the batch; rows tiled over the grid, reduced
    in-kernel into a (1,1) accumulator (no per-row HBM stores / extra XLA reduces).
    """
    r, l = x.shape
    tr = min(tr, _round_up(r, 8))
    r_p = _round_up(r, tr)
    l_p = _round_up(l, 128)
    x_p = jnp.pad(x.astype(jnp.float32), ((0, r_p - r), (0, l_p - l)),
                  constant_values=_NEG)
    w_p = jnp.pad(w.astype(jnp.float32), ((0, r_p - r), (0, l_p - l)))

    cost = pl.CostEstimate(
        flops=8 * r_p * l_p,
        transcendentals=r_p * l_p,
        bytes_accessed=8 * r_p * l_p + 4,
    )
    out = pl.pallas_call(
        functools.partial(_wls_sum_kernel, inv_beta=float(inv_beta)),
        out_shape=jax.ShapeDtypeStruct((1, 1), jnp.float32),
        grid=(r_p // tr,),
        in_specs=[pl.BlockSpec((tr, l_p), lambda i: (i, 0)),
                  pl.BlockSpec((tr, l_p), lambda i: (i, 0))],
        out_specs=pl.BlockSpec((1, 1), lambda i: (0, 0)),
        scratch_shapes=[pltpu.VMEM((1, 1), jnp.float32)],
        compiler_params=pltpu.CompilerParams(dimension_semantics=("arbitrary",)),
        cost_estimate=cost,
    )(x_p, w_p)
    return out[0, 0]


# --------------------------- CAPMemory_online (JAX) ------------------------ #

class CAPMemoryOnline:
    def __init__(self, all_img_cams, beta=0.05, alpha=0.01, bg_knn=50,
                 proxy_label_dict=None, proxy_cam_dict=None):
        self.beta = beta
        self.alpha = alpha                      # only used by the backward memory update
        self.bg_knn = bg_knn
        self.all_img_cams = np.asarray(all_img_cams)
        self.unique_cams = np.unique(self.all_img_cams)
        self.proxy_label_dict = proxy_label_dict or {}
        self.proxy_cam_dict = proxy_cam_dict or {}
        self.percam_memory = []
        self.cam_proxy_num = [0]
        self.client_memory_lenth = 0
        self._cam_start = {}
        self._tempVT_bf16 = None                # cached (D, P) bf16 memory bank

    def forward(self, features, global_features, plabel, proxy, cams=None,
                epoch=None, batch_ind=-1, init_intra_id_feat=()):
        # global_features is unused by loss_using_pseudo_percam_proxy (same as torch)
        return self._loss(features, plabel, proxy, cams, batch_ind, init_intra_id_feat)

    def _rebuild_memory(self, init_intra_id_feat):
        self.percam_memory = []
        self.client_memory_lenth = 0
        self.cam_proxy_num = [0]
        for cc in self.unique_cams:
            if len(init_intra_id_feat) > 0:
                proto = jnp.asarray(init_intra_id_feat[int(cc)], jnp.float32)
                self.percam_memory.append(proto)
                self.client_memory_lenth += proto.shape[0]
                self.cam_proxy_num.append(self.client_memory_lenth)
        # Cache the concatenated bank once, pre-transposed to (D, P) and cast to bf16
        # (the MXU's preferred (K, N) operand layout; no per-call concat/transposed feed).
        cam_start, off, mem_list = {}, 0, []
        for ii in self.unique_cams:
            cam_start[int(ii)] = off
            mem_list.append(self.percam_memory[int(ii)])
            off += int(self.percam_memory[int(ii)].shape[0])
        self._cam_start = cam_start
        self._tempVT_bf16 = jnp.concatenate(mem_list, axis=0).T.astype(jnp.bfloat16)

    def _loss(self, features, plabel, proxy, cams, batch_ind, init_intra_id_feat):
        if batch_ind == 0 or self._tempVT_bf16 is None:
            self._rebuild_memory(init_intra_id_feat)

        cams_np = np.asarray(cams)
        plabel_np = np.asarray(plabel)
        proxy_np = np.asarray(proxy)

        # ---- one bf16 MXU matmul for the whole batch: sims = feat @ memV.T (f32) ----
        sims = matmul_nt(features, self._tempVT_bf16)            # (N, P) f32, on device
        P = int(sims.shape[1])

        # single host sync; np.array() -> writable copy for the top-k selections
        sims_host = np.array(jax.device_get(sims), dtype=np.float32)

        # -------- host-side selection (mirrors the torch python dict loops) ------
        rows = []
        ce_groups = []
        for cc in np.unique(cams_np):
            inds = np.nonzero(cams_np == cc)[0]
            n_cc = int(inds.shape[0])
            start = self._cam_start[int(cc)]
            m_cc = int(self.percam_memory[int(cc)].shape[0])
            ce_groups.append((inds, start, m_cc))
            for r in inds:
                r = int(r)
                mapped_t = int(proxy_np[r]) - int(self.cam_proxy_num[int(cc)])
                # offline associate selection (top bg_knn background proxies)
                ori = np.asarray(self.proxy_label_dict[int(plabel_np[r])]).astype(np.int64)
                off_row = sims_host[r].copy()
                off_row[ori] = -10000.0
                sel = _top_k_inds(off_row, min(self.bg_knn, P))
                cat = np.concatenate([ori, sel]).astype(np.int32)
                # online selection (per-camera argmax tops, then global top-(30+pos))
                on_row = sims_host[r].copy()
                tops = []
                for c in self.unique_cams:
                    pi = np.asarray(self.proxy_cam_dict[int(c)]).astype(np.int64)
                    tops.append(int(pi[int(np.argmax(on_row[pi]))]))
                tops = np.asarray(tops, np.int64)
                osel = _top_k_inds(on_row[tops], min(3, tops.shape[0]))
                pos_idx = tops[osel].astype(np.int32)
                pos = int(pos_idx.shape[0])
                on_row[pos_idx] = 10000.0
                top_inds = _top_k_inds(on_row, min(30 + pos, P)).astype(np.int32)
                rows.append(dict(r=r, n_cc=n_cc, m_cc=m_cc, mapped_t=mapped_t,
                                 cat=cat, n_ori=int(ori.shape[0]),
                                 top_inds=top_inds, pos_idx=pos_idx, pos=pos))

        nrows = len(rows)
        assert nrows > 0
        assert all(rw["m_cc"] > 0 and rw["cat"].shape[0] > 0
                   and rw["top_inds"].shape[0] > 0 for rw in rows)  # no all-masked rows
        # common natural width; the kernel wrapper pads lanes to a multiple of 128
        L = max(max(rw["m_cc"] for rw in rows),
                max(rw["cat"].shape[0] for rw in rows),
                max(rw["top_inds"].shape[0] for rw in rows))

        # CE target folded into a weight row:  -sum_j w_j*log_softmax_j == (0.6/n) * CE
        ce_w = np.zeros((nrows, L), np.float32)
        # offline + online gathered rows (row order irrelevant: kernel sums all rows)
        oo_idx = np.zeros((2 * nrows, L), np.int32)
        oo_mask = np.zeros((2 * nrows, L), bool)
        oo_w = np.zeros((2 * nrows, L), np.float32)
        row_src = np.zeros((2 * nrows,), np.int32)
        for i, rw in enumerate(rows):
            ce_w[i, rw["mapped_t"]] = 0.6 / rw["n_cc"]
            row_src[i] = rw["r"]
            row_src[nrows + i] = rw["r"]
            lo = rw["cat"].shape[0]
            oo_idx[i, :lo] = rw["cat"]
            oo_mask[i, :lo] = True
            oo_w[i, :rw["n_ori"]] = (0.7 / rw["n_cc"]) / rw["n_ori"]
            ln = rw["top_inds"].shape[0]
            oo_idx[nrows + i, :ln] = rw["top_inds"]
            oo_mask[nrows + i, :ln] = True
            is_pos = np.isin(rw["top_inds"], rw["pos_idx"])
            oo_w[nrows + i, :ln][is_pos] = (0.7 / rw["n_cc"]) / rw["pos"]

        # ---- device side: CE logits are contiguous static column slices of sims ----
        ce_x_parts = []
        for inds, start, m_cc in ce_groups:
            part = sims[jnp.asarray(inds, jnp.int32), start:start + m_cc]
            ce_x_parts.append(jnp.pad(part, ((0, 0), (0, L - m_cc)),
                                      constant_values=_NEG))
        ce_x = jnp.concatenate(ce_x_parts, axis=0)               # (N, L), rows order

        # offline / online logits: one row gather + one column gather, masked pad
        oo_rows = jnp.take(sims, jnp.asarray(row_src), axis=0)   # (2N, P)
        oo_g = jnp.take_along_axis(oo_rows, jnp.asarray(oo_idx), axis=1)
        oo_x = jnp.where(jnp.asarray(oo_mask), oo_g, jnp.float32(_NEG))

        x_all = jnp.concatenate([ce_x, oo_x], axis=0)            # (3N, L)
        w_all = jnp.concatenate([jnp.asarray(ce_w), jnp.asarray(oo_w)], axis=0)

        # ---- one Pallas launch: weighted log-softmax sum over all 3N loss rows ----
        loss = weighted_logsoftmax_sum(x_all, w_all, inv_beta=1.0 / self.beta)
        return loss.reshape(1)


# ------------------------- pure-numpy reference ---------------------------- #

def _np_log_softmax(x):
    m = np.max(x, axis=-1, keepdims=True)
    return x - (m + np.log(np.sum(np.exp(x - m), axis=-1, keepdims=True)))


def reference_loss(features, plabel, proxy, cams, init_intra_id_feat, unique_cams,
                   proxy_label_dict, proxy_cam_dict, beta, bg_knn):
    feats = np.asarray(features, np.float32)
    percam_mem = [np.asarray(m, np.float32) for m in init_intra_id_feat]
    cam_proxy_num, tot = [0], 0
    for c in unique_cams:
        tot += percam_mem[int(c)].shape[0]
        cam_proxy_num.append(tot)
    tempV = np.concatenate([percam_mem[int(c)] for c in unique_cams], 0)
    cams = np.asarray(cams); plabel = np.asarray(plabel); proxy = np.asarray(proxy)
    loss = 0.0
    for cc in np.unique(cams):
        inds = np.nonzero(cams == cc)[0]
        ptargets, pfeat, pproxy = plabel[inds], feats[inds], proxy[inds]
        mapped = pproxy - cam_proxy_num[int(cc)]
        n = pfeat.shape[0]
        pinputs = pfeat @ percam_mem[int(cc)].T / beta
        ls = _np_log_softmax(pinputs)
        loss += 0.6 * (-np.mean(ls[np.arange(n), mapped]))
        tin = pfeat @ tempV.T
        off = tin.copy()
        tin = tin / beta
        assoc = 0.0
        for k in range(n):
            ori = np.asarray(proxy_label_dict[int(ptargets[k])])
            off[k, ori] = -10000.0
            sel = np.argsort(off[k])[-bg_knn:]
            cat = np.concatenate([tin[k, ori], tin[k, sel]])
            tgt = np.zeros(cat.shape[0], np.float32)
            tgt[:len(ori)] = 1.0 / len(ori)
            assoc += -np.sum(_np_log_softmax(cat[None])[0] * tgt)
        loss += 0.7 * assoc / n
    for cc in np.unique(cams):
        inds = np.nonzero(cams == cc)[0]
        pfeat = feats[inds]
        n = pfeat.shape[0]
        tin = pfeat @ tempV.T
        on = tin.copy()
        tin = tin / beta
        ol = 0.0
        for k in range(n):
            tops = []
            for c in unique_cams:
                pi = np.asarray(proxy_cam_dict[int(c)])
                tops.append(int(pi[int(np.argmax(on[k, pi]))]))
            tops = np.asarray(tops)
            osel = np.argsort(on[k, tops])[-3:]
            pos = osel.shape[0]
            on[k, tops[osel]] = 10000.0
            top_inds = np.argsort(on[k])[-30 - pos:]
            sel_input = tin[k, top_inds]
            tgt = np.zeros(top_inds.shape[0], np.float32)
            tgt[-pos:] = 1.0 / pos
            ol += -np.sum(_np_log_softmax(sel_input[None])[0] * tgt)
        loss += 0.7 * ol / n
    return float(loss)


# ----------------------------------- main ----------------------------------- #

if __name__ == "__main__":
    D = 32                  # feature dim
    num_cams = 2
    per_cam_proxies = 8     # proxies per camera -> percam_tempV has 16 rows
    N = 8                   # batch size

    key = jax.random.PRNGKey(0)
    k1, k2, k3 = jax.random.split(key, 3)

    def l2n(x):
        return x / jnp.linalg.norm(x, axis=-1, keepdims=True)

    mem0 = l2n(jax.random.normal(k1, (per_cam_proxies, D), jnp.float32))
    mem1 = l2n(jax.random.normal(k2, (per_cam_proxies, D), jnp.float32))
    init_intra_id_feat = [mem0, mem1]

    features = l2n(jax.random.normal(k3, (N, D), jnp.float32))
    global_features = features                      # unused by the forward loss
    cams = np.array([0, 0, 0, 0, 1, 1, 1, 1], np.int32)
    plabel = np.array([0, 1, 2, 3, 0, 1, 2, 3], np.int32)
    # global proxy index per sample (cam0 proxies 0..7, cam1 proxies 8..15)
    proxy = np.array([0, 1, 2, 3, 8, 9, 10, 11], np.int32)

    # pseudo-label -> global proxy indices of that identity (one proxy per cam)
    proxy_label_dict = {p: np.array([p, p + per_cam_proxies], np.int64)
                        for p in range(per_cam_proxies)}
    # camera -> its global proxy indices
    proxy_cam_dict = {0: np.arange(0, per_cam_proxies),
                      1: np.arange(per_cam_proxies, 2 * per_cam_proxies)}
    all_img_cams = np.array([0] * 16 + [1] * 16, np.int32)

    module = CAPMemoryOnline(all_img_cams, beta=0.05, alpha=0.01, bg_knn=4,
                             proxy_label_dict=proxy_label_dict,
                             proxy_cam_dict=proxy_cam_dict)

    loss = module.forward(features, global_features, plabel, proxy, cams=cams,
                          batch_ind=0, init_intra_id_feat=init_intra_id_feat)
    loss = jax.block_until_ready(loss)

    ref = reference_loss(features, plabel, proxy, cams, init_intra_id_feat,
                         module.unique_cams, proxy_label_dict, proxy_cam_dict,
                         beta=0.05, bg_knn=4)

    assert loss.shape == (1,)
    # bf16 MXU operands (per the perf review) plus the 1/beta = 20x logit amplification
    # give bf16-class end-to-end precision; the tolerance is sized accordingly.
    assert np.allclose(float(np.asarray(loss)[0]), ref, rtol=5e-2, atol=2e-1), \
        (float(np.asarray(loss)[0]), ref)
    print("KERNEL_OK")
</pallas_src>

<mosaic_0001>
module attributes {stable_mosaic.version = 11 : i64} {
  func.func @_matmul_kernel(%arg0: i32, %arg1: i32, %arg2: i32, %arg3: memref<16x128xbf16, #tpu.memory_space<vmem>>, %arg4: memref<128x128xbf16, #tpu.memory_space<vmem>>, %arg5: memref<16x128xf32, #tpu.memory_space<vmem>>, %arg6: memref<16x128xf32, #tpu.memory_space<vmem>>) attributes {dimension_semantics = [#tpu.dimension_semantics<parallel>, #tpu.dimension_semantics<parallel>, #tpu.dimension_semantics<arbitrary>], iteration_bounds = array<i64: 1, 1, 1>, scalar_prefetch = 0 : i64, scratch_operands = 1 : i64, tpu.core_type = #tpu.core_type<tc>, window_params = [{transform_indices = @transform_0, window_bounds = array<i64: 16, 128>}, {transform_indices = @transform_1, window_bounds = array<i64: 128, 128>}, {transform_indices = @transform_2, window_bounds = array<i64: 16, 128>}]} {
    %c0_i32 = arith.constant 0 : i32
    %0 = arith.cmpi eq, %arg2, %c0_i32 : i32
    %1 = arith.extui %0 : i1 to i32
    %c0_i32_0 = arith.constant 0 : i32
    %2 = arith.cmpi ne, %1, %c0_i32_0 : i32
    scf.if %2 {
      %cst_10 = arith.constant 0.000000e+00 : f32
      %12 = vector.broadcast %cst_10 : f32 to vector<16x128xf32>
      %c0_11 = arith.constant 0 : index
      %c0_12 = arith.constant 0 : index
      %13 = vector.load %arg6[%c0_11, %c0_12] : memref<16x128xf32, #tpu.memory_space<vmem>>, vector<16x128xf32>
      tpu.vector_store %arg6[%c0_11, %c0_12], %12 {strides = array<i32>} : memref<16x128xf32, #tpu.memory_space<vmem>>, vector<16x128xf32>,
    } else {
    }
    %c0 = arith.constant 0 : index
    %c0_1 = arith.constant 0 : index
    %3 = vector.load %arg6[%c0, %c0_1] : memref<16x128xf32, #tpu.memory_space<vmem>>, vector<16x128xf32>
    %c0_2 = arith.constant 0 : index
    %c0_3 = arith.constant 0 : index
    %4 = vector.load %arg3[%c0_2, %c0_3] : memref<16x128xbf16, #tpu.memory_space<vmem>>, vector<16x128xbf16>
    %c0_4 = arith.constant 0 : index
    %c0_5 = arith.constant 0 : index
    %5 = vector.load %arg4[%c0_4, %c0_5] : memref<128x128xbf16, #tpu.memory_space<vmem>>, vector<128x128xbf16>
    %cst = arith.constant dense<0.000000e+00> : vector<16x128xf32>
    %6 = tpu.matmul %4, %5, %cst {dimension_numbers = #tpu.dot_dimension_numbers<[1], [0], [0], [1], [0, 0, 1, 1], [], []>} : vector<16x128xbf16>, vector<128x128xbf16>, vector<16x128xf32> -> vector<16x128xf32>
    %7 = arith.addf %3, %6 : vector<16x128xf32>
    %c0_6 = arith.constant 0 : index
    %c0_7 = arith.constant 0 : index
    %8 = vector.load %arg6[%c0_6, %c0_7] : memref<16x128xf32, #tpu.memory_space<vmem>>, vector<16x128xf32>
    tpu.vector_store %arg6[%c0_6, %c0_7], %7 {strides = array<i32>} : memref<16x128xf32, #tpu.memory_space<vmem>>, vector<16x128xf32>,
    %c0_i32_8 = arith.constant 0 : i32
    %9 = arith.cmpi eq, %arg2, %c0_i32_8 : i32
    %10 = arith.extui %9 : i1 to i32
    %c0_i32_9 = arith.constant 0 : i32
    %11 = arith.cmpi ne, %10, %c0_i32_9 : i32
    scf.if %11 {
      %c0_10 = arith.constant 0 : index
      %c0_11 = arith.constant 0 : index
      %12 = vector.load %arg6[%c0_10, %c0_11] : memref<16x128xf32, #tpu.memory_space<vmem>>, vector<16x128xf32>
      %c0_12 = arith.constant 0 : index
      %c0_13 = arith.constant 0 : index
      %13 = vector.load %arg5[%c0_12, %c0_13] : memref<16x128xf32, #tpu.memory_space<vmem>>, vector<16x128xf32>
      tpu.vector_store %arg5[%c0_12, %c0_13], %12 {strides = array<i32>} : memref<16x128xf32, #tpu.memory_space<vmem>>, vector<16x128xf32>,
    } else {
    }
    return
  }
  func.func @transform_0(%arg0: i32, %arg1: i32, %arg2: i32) -> (i32, i32) {
    %c0_i32 = arith.constant 0 : i32
    return %arg0, %arg2 : i32, i32
  }
  func.func @transform_1(%arg0: i32, %arg1: i32, %arg2: i32) -> (i32, i32) {
    %c0_i32 = arith.constant 0 : i32
    return %arg2, %arg1 : i32, i32
  }
  func.func @transform_2(%arg0: i32, %arg1: i32, %arg2: i32) -> (i32, i32) {
    %c0_i32 = arith.constant 0 : i32
    return %arg0, %arg1 : i32, i32
  }
}

</mosaic_0001>

<bundles_post_ra>
// kernel: tpu_custom_call.1
= control target key start
LH: loop header
LB: loop body
LE: loop exit
PB: predicated region body
PF: predicated region fallthrough
CT: control target
= control target key end

     0   :  { %7 = vsyncpa [#allocation4], 0  ;;  %s379_s0 = inlined_call_operand.hbm [shape: bf16[16,128], index: 0, kind: input, shape index: {}]   ;;  %s380_s1 = inlined_call_operand.hbm [shape: bf16[128,128], index: 1, kind: input, shape index: {}]   ;;  %s381_s2 = inlined_call_operand.hbm [shape: f32[16,128], index: 2, kind: output, shape index: {}]  }
   0x1   :  { %8 = vsyncpa [#allocation7], 0 }
   0x2   :  { %9 = vsyncpa [#allocation5], 0  ;;  %s319_s9 = smov [#allocation3]   ;;  %s247_s13 = scalar_lea.hbm %s379_s0, 128 }
   0x3   :  { %s15_s10 = sshll.u32 %s319_s9, 4  ;;  %p248_p0 = scmp.ne.s32.totalorder %s379_s0, %s247_s13  ;;  %s16_s10 = int_to_ptr.vmem [resolvable:$true] %s15_s10 }
   0x4   :  { %p251_p1 = scmp.lt.u32.totalorder %s247_s13, %s379_s0 }
   0x6   :  { %p253_p2 = pnand %p251_p1, %p248_p0 }
   0x8   :  { %256 = shalt.err (!%p253_p2)
}
   0x9   :  { %s257_s18 = scalar_lea.vmem %s16_s10, 128  ;;  %p262_p4 = scmp.lt.s32.totalorder %s16_s10, %s16_s10 }
   0xa   :  { %p258_p3 = scmp.ne.s32.totalorder %s16_s10, %s257_s18  ;;  %p263_p5 = scmp.lt.s32.totalorder %s257_s18, %s257_s18 }
   0xc   :  { %p264_p6 = por %p263_p5, %p262_p4 }
   0xe   :  { %p265_p7 = pnand %p264_p6, %p258_p3 }
  0x10   :  { %268 = shalt.err (!%p265_p7)
}
  0x11   :  { %s320_s19 = smov 64   ;;  %s321_s20 = smov 4  }
  0x12   :  { %21 = dma.hbm_to_vmem [thread:$0]  %s379_s0, 128, %s16_s10, [#allocation4], %s320_s19, %s320_s19, %s321_s20  }
  0x13   :  { %s322_s23 = smov [#allocation6]   ;;  %s269_s27 = scalar_lea.hbm %s380_s1, 1024 }
  0x14   :  { %s27_s24 = sshll.u32 %s322_s23, 4  ;;  %p270_p8 = scmp.ne.s32.totalorder %s380_s1, %s269_s27  ;;  %s28_s24 = int_to_ptr.vmem [resolvable:$true] %s27_s24 }
  0x15   :  { %p273_p9 = scmp.lt.u32.totalorder %s269_s27, %s380_s1 }
  0x17   :  { %p275_p10 = pnand %p273_p9, %p270_p8 }
  0x19   :  { %278 = shalt.err (!%p275_p10)
}
  0x1a   :  { %s279_s4 = scalar_lea.vmem %s28_s24, 1024  ;;  %p284_p12 = scmp.lt.s32.totalorder %s28_s24, %s28_s24 }
  0x1b   :  { %p280_p11 = scmp.ne.s32.totalorder %s28_s24, %s279_s4  ;;  %p285_p13 = scmp.lt.s32.totalorder %s279_s4, %s279_s4 }
  0x1d   :  { %p286_p0 = por %p285_p13, %p284_p12 }
  0x1f   :  { %p287_p1 = pnand %p286_p0, %p280_p11 }
  0x21   :  { %290 = shalt.err (!%p287_p1)
}
  0x22   :  { %33 = dma.hbm_to_vmem [thread:$0]  %s380_s1, 1024, %s28_s24, [#allocation7], %s320_s19, %s320_s19, %s321_s20  }
  0x23   :  { %313 = dma.done.wait [#allocation4], 128  }
  0x24   :  { %314 = vsyncadd [#allocation4], 4294967168 }
  0x25   :  { %315 = dma.done.wait [#allocation7], 1024  }
  0x26   :  { %316 = vsyncadd [#allocation7], 4294966272  ;;  %v323_v0 = vmov 0.0   ;;  %vm324_vm0 = vmmov 0   ;;  %v238_v1 = vld [vmem:[#allocation6] sm:$0xff]   ;;  %v239_v2 = vld [vmem:[#allocation6 + $0x8] sm:$0xff]  }
  0x27   :  { %209 = vmatprep.subr.bf16.mxu0 %v323_v0  ;;  %225 = vmatprep.mubr.msk.bf16.mxu0 %vm324_vm0, %v323_v0  ;;  %v240_v3 = vld [vmem:[#allocation6 + $0x10] sm:$0xff]   ;;  %v241_v4 = vld [vmem:[#allocation6 + $0x18] sm:$0xff]   ;;  %v242_v5 = vld [vmem:[#allocation6 + $0x20] sm:$0xff]   ;;  %s325_s1 = smov [#allocation8]  }
  0x28   :  { %210 = vmatpush3.bf16.msra.mxu0 %v238_v1  ;;  %v243_v6 = vld [vmem:[#allocation6 + $0x28] sm:$0xff]   ;;  %v244_v7 = vld [vmem:[#allocation6 + $0x30] sm:$0xff]   ;;  %v245_v8 = vld [vmem:[#allocation6 + $0x38] sm:$0xff]   ;;  %s178_s6 = sshll.u32 %s325_s1, 4  ;;  %s179_s6 = int_to_ptr.vmem [resolvable:$true] %s178_s6 }
  0x29   :  { %211 = vmatprep.subr.bf16.mxu0 %v323_v0  ;;  %v246_v9 = vld [vmem:[#allocation3] sm:$0xff]   ;;  %s291_s7 = scalar_lea.vmem %s179_s6, 256  ;;  %p296_p3 = scmp.lt.s32.totalorder %s179_s6, %s179_s6 }
  0x2a   :  { %p292_p2 = scmp.ne.s32.totalorder %s179_s6, %s291_s7  ;;  %p297_p4 = scmp.lt.s32.totalorder %s291_s7, %s291_s7 }
  0x2c   :  { %212 = vmatpush3.bf16.msra.mxu0 %v239_v2  ;;  %p298_p5 = por %p297_p4, %p296_p3 }
  0x2d   :  { %213 = vmatprep.subr.bf16.mxu0 %v323_v0 }
  0x2e   :  { %p299_p6 = pnand %p298_p5, %p292_p2 }
  0x30   :  { %214 = vmatpush3.bf16.msra.mxu0 %v240_v3 }
  0x31   :  { %215 = vmatprep.subr.bf16.mxu0 %v323_v0 }
  0x34   :  { %216 = vmatpush3.bf16.msra.mxu0 %v241_v4 }
  0x35   :  { %217 = vmatprep.subr.bf16.mxu0 %v323_v0 }
  0x38   :  { %218 = vmatpush3.bf16.msra.mxu0 %v242_v5 }
  0x39   :  { %219 = vmatprep.subr.bf16.mxu0 %v323_v0 }
  0x3c   :  { %220 = vmatpush3.bf16.msra.mxu0 %v243_v6 }
  0x3d   :  { %221 = vmatprep.subr.bf16.mxu0 %v323_v0 }
  0x40   :  { %222 = vmatpush3.bf16.msra.mxu0 %v244_v7 }
  0x41   :  { %223 = vmatprep.subr.bf16.mxu0 %v323_v0 }
  0x44   :  { %224 = vmatpush3.bf16.msra.mxu0 %v245_v8 }
  0x47   :  { %226 = vmatmul.mubr.bf16.vlgmr.msra.gmra.mrb[0].mxu0 %v246_v9 }
 0x11a   :  { %v155_v10 = vpop.f32.mrb[0].mxu0 }
 0x11b   :  { %171 = vst [vmem:[#allocation8] sm:$0xff] %v155_v10  ;;  %v227_v11 = vpop.f32.mrb[1].mxu0 }
 0x11c   :  { %v158_v12 = vpop.f32.mrb[2].mxu0 }
 0x11d   :  { %172 = vst [vmem:[#allocation8 + $0x8] sm:$0xff] %v158_v12  ;;  %v228_v13 = vpop.f32.mrb[3].mxu0 }
 0x11e   :  { %302 = shalt.err (!%p299_p6)
}
 0x11f   :  { %s303_s10 = scalar_lea.hbm %s381_s2, 256 }
 0x120   :  { %p304_p7 = scmp.ne.s32.totalorder %s381_s2, %s303_s10  ;;  %p307_p8 = scmp.lt.u32.totalorder %s303_s10, %s381_s2 }
 0x122   :  { %p309_p9 = pnand %p307_p8, %p304_p7 }
 0x124   :  { %312 = shalt.err (!%p309_p9)
}
 0x125   :  { %s326_s15 = smov 128   ;;  %s327_s16 = smov 8  }
 0x126   :  { %184 = dma.vmem_to_hbm [thread:$0]  %s179_s6, 256, %s381_s2, [#allocation5], %s326_s15, %s326_s15, %s327_s16  }
 0x127   :  { %317 = dma.done.wait [#allocation5], 256  }
 0x128   :  { %318 = vsyncadd [#allocation5], 4294967040 }
 0x129   :  { %188 = vsyncpa [#allocation4], 1 }
 0x12a   :  { %189 = vsyncpa [#allocation7], 1 }
 0x12b   :  { %190 = vsyncpa [#allocation5], 1 }

</bundles_post_ra>
